<compile_context>
chip_gen: v7x
topology: tpu7x:2x2x1
jax: 0.10.0
libtpu: 0.0.40
codegen_flags: <defaults>
</compile_context>

<pallas_src>
import functools

import jax
import jax.numpy as jnp
from jax.experimental import pallas as pl
from jax.experimental.pallas import tpu as pltpu

IN_FEATURES = 4
HIDDEN = 30
OUT_FEATURES = 1

# Upper cap on the batch tile: keeps double-buffered x/out + the (30,TILE_B)
# f32 hidden intermediate comfortably inside the default scoped VMEM limit on
# every generation (tightest is v7x: 32 MiB scoped / 64 MiB physical).
MAX_TILE_B = 32768


def _round_up(n: int, m: int) -> int:
    return ((n + m - 1) // m) * m


def _choose_tile(B: int, tile_b: int) -> int:
    """Lane-aligned batch tile, capped for VMEM, with >=2 grid steps for v7x."""
    tile_b = _round_up(max(tile_b, 128), 128)
    tile_b = min(tile_b, MAX_TILE_B)
    bp128 = _round_up(B, 128)
    if bp128 <= 128:
        return 128                       # tiny batch: single tile, no padding blow-up
    # Keep at least two grid steps so both v7x TensorCores get a tile.
    half = _round_up((B + 1) // 2, 128)
    return min(tile_b, half)


def mlp_kernel(x_ref, w1t_ref, b1_ref, w2_ref, b2_ref, o_ref):
    # x_ref  : (IN_FEATURES, TILE_B)  feature-major, batch on the 128-lane axis
    # w1t_ref: (HIDDEN, IN_FEATURES)  == fc1.weight (PyTorch layout), compute dtype
    # b1_ref : (HIDDEN, 1)            compute dtype
    # w2_ref : (HIDDEN, 1)            == fc2.weight.T, f32
    # b2_ref : (1, 1)                 f32
    # o_ref  : (1, TILE_B)            f32, lane-dense output tile
    xt = x_ref[...]                     # (4, TILE_B)
    w1t = w1t_ref[...]                  # (30, 4)

    # fc1 + bias as 4 outer-product FMAs on the VPU (K=4 is far below the MXU
    # tile, so the systolic array would be almost entirely padding).
    h = b1_ref[...]                     # (30, 1) -> broadcasts over lanes below
    for i in range(IN_FEATURES):        # static unroll, 4 terms
        h = h + w1t[:, i:i + 1] * xt[i:i + 1, :]     # (30,1)*(1,T) -> (30,T)
    h = jnp.maximum(h, 0.0)             # ReLU (compute dtype)

    # fc2 (N=1) as a weighted sublane reduction (XLU), accumulated in f32.
    y = (jnp.sum(h.astype(jnp.float32) * w2_ref[...], axis=0, keepdims=True)
         + b2_ref[...])                 # (1, TILE_B) f32

    # Exact sigmoid: exp on the EUP, exact divide; epilogue is ~3% of the work.
    o_ref[...] = 1.0 / (1.0 + jnp.exp(-y))


@functools.partial(jax.jit, static_argnames=("tile_b", "compute_dtype"))
def mlp_forward(x, w1, b1, w2, b2, *, tile_b=16384, compute_dtype=jnp.float32):
    """sigmoid(relu(x @ w1 + b1) @ w2 + b2).

    x : (B, 4) f32, w1: (4, 30) (== fc1.weight.T), b1: (30,),
    w2: (30, 1) (== fc2.weight.T), b2: (1,).  Returns (B, 1) f32.

    compute_dtype: dtype for the fc1 outer-product loop / ReLU and the x tile.
      Use jnp.bfloat16 on v6e / v7x (native bf16 VPU, half the x DMA bytes);
      keep jnp.float32 on v5e.  fc2 + sigmoid always run in f32.
    """
    B = x.shape[0]
    tile_b = _choose_tile(B, tile_b)
    bp = _round_up(B, tile_b)
    n_tiles = bp // tile_b

    cdt = compute_dtype
    # Feature-major, lane-dense x, zero-padded tail, cast to the compute dtype.
    # allow_input_fusion below lets XLA fuse this transpose/pad/cast into the
    # pallas_call operand instead of running a separate HBM pass over x.
    xt = jnp.zeros((IN_FEATURES, bp), cdt).at[:, :B].set(x.T.astype(cdt))
    w1t = w1.T.astype(cdt)                               # (30, 4)
    b1_2d = b1.reshape(HIDDEN, 1).astype(cdt)
    w2_2d = w2.reshape(HIDDEN, OUT_FEATURES).astype(jnp.float32)
    b2_2d = b2.reshape(1, 1).astype(jnp.float32)

    out_t = pl.pallas_call(
        mlp_kernel,
        out_shape=jax.ShapeDtypeStruct((OUT_FEATURES, bp), jnp.float32),
        grid=(n_tiles,),
        in_specs=[
            # x tile: pipelined / double-buffered over the batch grid.
            pl.BlockSpec((IN_FEATURES, tile_b), lambda i: (0, i)),
            # Weights & biases: constant block index -> stay resident in VMEM.
            pl.BlockSpec((HIDDEN, IN_FEATURES), lambda i: (0, 0)),
            pl.BlockSpec((HIDDEN, 1), lambda i: (0, 0)),
            pl.BlockSpec((HIDDEN, 1), lambda i: (0, 0)),
            pl.BlockSpec((1, 1), lambda i: (0, 0)),
        ],
        out_specs=pl.BlockSpec((OUT_FEATURES, tile_b), lambda i: (0, i)),
        compiler_params=pltpu.CompilerParams(
            dimension_semantics=("parallel",),           # v7x: shard tiles across 2 TCs
            allow_input_fusion=[True, False, False, False, False],
        ),
    )(xt, w1t, b1_2d, w2_2d, b2_2d)

    # Back to the PyTorch-facing (B, 1) layout (pure layout plumbing).
    return out_t[:, :B].T


if __name__ == "__main__":
    key = jax.random.PRNGKey(0)
    kx, k1, k2, k3, k4 = jax.random.split(key, 5)

    # Small batch that still exercises two grid tiles (v7x 2-TC path) and a
    # ragged tail that gets padded/discarded.
    B = 300
    x = jax.random.normal(kx, (B, IN_FEATURES), jnp.float32)
    w1 = jax.random.normal(k1, (IN_FEATURES, HIDDEN), jnp.float32) * 0.5   # fc1.weight.T
    b1 = jax.random.normal(k2, (HIDDEN,), jnp.float32) * 0.1
    w2 = jax.random.normal(k3, (HIDDEN, OUT_FEATURES), jnp.float32) * 0.5  # fc2.weight.T
    b2 = jax.random.normal(k4, (OUT_FEATURES,), jnp.float32) * 0.1

    # Pure-JAX reference of the same forward pass.
    ref = jax.nn.sigmoid(jnp.maximum(x @ w1 + b1, 0.0) @ w2 + b2)

    # f32 path (default; recommended on v5e).  Exact sigmoid -> tight tolerance.
    out = jax.block_until_ready(mlp_forward(x, w1, b1, w2, b2))
    assert out.shape == (B, OUT_FEATURES)
    err_f32 = float(jnp.max(jnp.abs(out - ref)))
    assert err_f32 < 1e-5, err_f32

    # bf16 fc1 path (recommended on v6e / v7x: native bf16 VPU halves the
    # VALU-bound fc1 loop and the x DMA bytes; fc2 + sigmoid stay f32).
    out_bf16 = jax.block_until_ready(
        mlp_forward(x, w1, b1, w2, b2, compute_dtype=jnp.bfloat16))
    err_bf16 = float(jnp.max(jnp.abs(out_bf16 - ref)))
    assert err_bf16 < 5e-2, err_bf16

    print("KERNEL_OK")
</pallas_src>

<mosaic_0001>
module attributes {stable_mosaic.version = 11 : i64} {
  func.func @mlp_kernel(%arg0: i32, %arg1: memref<4x256xf32, #tpu.memory_space<vmem>>, %arg2: memref<30x4xf32, #tpu.memory_space<vmem>>, %arg3: memref<30x1xf32, #tpu.memory_space<vmem>>, %arg4: memref<30x1xf32, #tpu.memory_space<vmem>>, %arg5: memref<1x1xf32, #tpu.memory_space<vmem>>, %arg6: memref<1x256xf32, #tpu.memory_space<vmem>>) attributes {dimension_semantics = [#tpu.dimension_semantics<parallel>], iteration_bounds = array<i64: 2>, scalar_prefetch = 0 : i64, scratch_operands = 0 : i64, tpu.core_type = #tpu.core_type<tc>, window_params = [{transform_indices = @transform_0, window_bounds = array<i64: 4, 256>}, {pipeline_mode = #tpu.pipeline_mode<synchronous>, transform_indices = @transform_1, window_bounds = array<i64: 30, 4>}, {pipeline_mode = #tpu.pipeline_mode<synchronous>, transform_indices = @transform_2, window_bounds = array<i64: 30, 1>}, {pipeline_mode = #tpu.pipeline_mode<synchronous>, transform_indices = @transform_3, window_bounds = array<i64: 30, 1>}, {pipeline_mode = #tpu.pipeline_mode<synchronous>, transform_indices = @transform_4, window_bounds = array<i64: 1, 1>}, {transform_indices = @transform_5, window_bounds = array<i64: 1, 256>}]} {
    %c0 = arith.constant 0 : index
    %c0_0 = arith.constant 0 : index
    %0 = vector.load %arg1[%c0, %c0_0] : memref<4x256xf32, #tpu.memory_space<vmem>>, vector<4x256xf32>
    %c0_1 = arith.constant 0 : index
    %c0_2 = arith.constant 0 : index
    %1 = vector.load %arg2[%c0_1, %c0_2] : memref<30x4xf32, #tpu.memory_space<vmem>>, vector<30x4xf32>
    %c0_3 = arith.constant 0 : index
    %c0_4 = arith.constant 0 : index
    %2 = vector.load %arg3[%c0_3, %c0_4] : memref<30x1xf32, #tpu.memory_space<vmem>>, vector<30x1xf32>
    %3 = vector.extract_strided_slice %1 {offsets = [0, 0], sizes = [30, 1], strides = [1, 1]} : vector<30x4xf32> to vector<30x1xf32>
    %4 = vector.extract_strided_slice %0 {offsets = [0, 0], sizes = [1, 256], strides = [1, 1]} : vector<4x256xf32> to vector<1x256xf32>
    %5 = vector.broadcast %3 : vector<30x1xf32> to vector<30x256xf32>
    %6 = vector.broadcast %4 : vector<1x256xf32> to vector<30x256xf32>
    %7 = arith.mulf %5, %6 : vector<30x256xf32>
    %8 = vector.broadcast %2 : vector<30x1xf32> to vector<30x256xf32>
    %9 = arith.addf %8, %7 : vector<30x256xf32>
    %10 = vector.extract_strided_slice %1 {offsets = [0, 1], sizes = [30, 1], strides = [1, 1]} : vector<30x4xf32> to vector<30x1xf32>
    %11 = vector.extract_strided_slice %0 {offsets = [1, 0], sizes = [1, 256], strides = [1, 1]} : vector<4x256xf32> to vector<1x256xf32>
    %12 = vector.broadcast %10 : vector<30x1xf32> to vector<30x256xf32>
    %13 = vector.broadcast %11 : vector<1x256xf32> to vector<30x256xf32>
    %14 = arith.mulf %12, %13 : vector<30x256xf32>
    %15 = arith.addf %9, %14 : vector<30x256xf32>
    %16 = vector.extract_strided_slice %1 {offsets = [0, 2], sizes = [30, 1], strides = [1, 1]} : vector<30x4xf32> to vector<30x1xf32>
    %17 = vector.extract_strided_slice %0 {offsets = [2, 0], sizes = [1, 256], strides = [1, 1]} : vector<4x256xf32> to vector<1x256xf32>
    %18 = vector.broadcast %16 : vector<30x1xf32> to vector<30x256xf32>
    %19 = vector.broadcast %17 : vector<1x256xf32> to vector<30x256xf32>
    %20 = arith.mulf %18, %19 : vector<30x256xf32>
    %21 = arith.addf %15, %20 : vector<30x256xf32>
    %22 = vector.extract_strided_slice %1 {offsets = [0, 3], sizes = [30, 1], strides = [1, 1]} : vector<30x4xf32> to vector<30x1xf32>
    %23 = vector.extract_strided_slice %0 {offsets = [3, 0], sizes = [1, 256], strides = [1, 1]} : vector<4x256xf32> to vector<1x256xf32>
    %24 = vector.broadcast %22 : vector<30x1xf32> to vector<30x256xf32>
    %25 = vector.broadcast %23 : vector<1x256xf32> to vector<30x256xf32>
    %26 = arith.mulf %24, %25 : vector<30x256xf32>
    %27 = arith.addf %21, %26 : vector<30x256xf32>
    %cst = arith.constant 0.000000e+00 : f32
    %28 = vector.broadcast %cst : f32 to vector<30x256xf32>
    %29 = arith.maximumf %27, %28 : vector<30x256xf32>
    %c0_5 = arith.constant 0 : index
    %c0_6 = arith.constant 0 : index
    %30 = vector.load %arg4[%c0_5, %c0_6] : memref<30x1xf32, #tpu.memory_space<vmem>>, vector<30x1xf32>
    %31 = vector.broadcast %30 : vector<30x1xf32> to vector<30x256xf32>
    %32 = arith.mulf %29, %31 : vector<30x256xf32>
    %cst_7 = arith.constant dense<0.000000e+00> : vector<256xf32>
    %33 = vector.multi_reduction <add>, %32, %cst_7 [0] : vector<30x256xf32> to vector<256xf32>
    %34 = vector.shape_cast %33 : vector<256xf32> to vector<1x256xf32>
    %c0_8 = arith.constant 0 : index
    %c0_9 = arith.constant 0 : index
    %35 = vector.load %arg5[%c0_8, %c0_9] : memref<1x1xf32, #tpu.memory_space<vmem>>, vector<1x1xf32>
    %36 = vector.broadcast %35 : vector<1x1xf32> to vector<1x256xf32>
    %37 = arith.addf %34, %36 : vector<1x256xf32>
    %cst_10 = arith.constant 0.000000e+00 : f32
    %38 = vector.broadcast %cst_10 : f32 to vector<1x256xf32>
    %39 = arith.subf %38, %37 : vector<1x256xf32>
    %40 = math.exp %39 : vector<1x256xf32>
    %cst_11 = arith.constant 1.000000e+00 : f32
    %41 = vector.broadcast %cst_11 : f32 to vector<1x256xf32>
    %42 = arith.addf %41, %40 : vector<1x256xf32>
    %cst_12 = arith.constant 1.000000e+00 : f32
    %43 = vector.broadcast %cst_12 : f32 to vector<1x256xf32>
    %44 = arith.divf %43, %42 : vector<1x256xf32>
    %c0_13 = arith.constant 0 : index
    %c0_14 = arith.constant 0 : index
    %45 = vector.load %arg6[%c0_13, %c0_14] : memref<1x256xf32, #tpu.memory_space<vmem>>, vector<1x256xf32>
    tpu.vector_store %arg6[%c0_13, %c0_14], %44 {strides = array<i32>} : memref<1x256xf32, #tpu.memory_space<vmem>>, vector<1x256xf32>,
    return
  }
  func.func @transform_0(%arg0: i32) -> (i32, i32) {
    %c0_i32 = arith.constant 0 : i32
    %c0_i32_0 = arith.constant 0 : i32
    return %c0_i32, %arg0 : i32, i32
  }
  func.func @transform_1(%arg0: i32) -> (i32, i32) {
    %c0_i32 = arith.constant 0 : i32
    %c0_i32_0 = arith.constant 0 : i32
    %c0_i32_1 = arith.constant 0 : i32
    return %c0_i32, %c0_i32_0 : i32, i32
  }
  func.func @transform_2(%arg0: i32) -> (i32, i32) {
    %c0_i32 = arith.constant 0 : i32
    %c0_i32_0 = arith.constant 0 : i32
    %c0_i32_1 = arith.constant 0 : i32
    return %c0_i32, %c0_i32_0 : i32, i32
  }
  func.func @transform_3(%arg0: i32) -> (i32, i32) {
    %c0_i32 = arith.constant 0 : i32
    %c0_i32_0 = arith.constant 0 : i32
    %c0_i32_1 = arith.constant 0 : i32
    return %c0_i32, %c0_i32_0 : i32, i32
  }
  func.func @transform_4(%arg0: i32) -> (i32, i32) {
    %c0_i32 = arith.constant 0 : i32
    %c0_i32_0 = arith.constant 0 : i32
    %c0_i32_1 = arith.constant 0 : i32
    return %c0_i32, %c0_i32_0 : i32, i32
  }
  func.func @transform_5(%arg0: i32) -> (i32, i32) {
    %c0_i32 = arith.constant 0 : i32
    %c0_i32_0 = arith.constant 0 : i32
    return %c0_i32, %arg0 : i32, i32
  }
}

</mosaic_0001>

<bundles_post_ra>
// kernel: mlp_forward.2
= control target key start
LH: loop header
LB: loop body
LE: loop exit
PB: predicated region body
PF: predicated region fallthrough
CT: control target
= control target key end

     0   :  { %s805_s25 = smov 0   ;;  %s927_s0 = inlined_call_operand.vmem [shape: f32[30,4], index: 0, kind: input, shape index: {}]   ;;  %s928_s1 = inlined_call_operand.vmem [shape: f32[30,1], index: 1, kind: input, shape index: {}]   ;;  %s929_s2 = inlined_call_operand.vmem [shape: f32[30,1], index: 2, kind: input, shape index: {}]   ;;  %s930_s3 = inlined_call_operand.<no memory space> [shape: f32[1,1], index: 3, kind: input, shape index: {}]   ;;  %s931_s4 = inlined_call_operand.vmem [shape: f32[4,300], index: 4, kind: input, shape index: {}]   ;;  %s932_s5 = inlined_call_operand.<no memory space> [shape: f32[], index: 5, kind: input, shape index: {}]   ;;  %s933_s6 = inlined_call_operand.vmem [shape: f32[1,512], index: 6, kind: output, shape index: {}]  }
   0x1   :  { %v800_v0 = vstv %s932_s5  ;;  %v12_v1 = vstv %s930_s3 }
   0x2   :  { %13 = vst [vmem:[#allocation7] sm:$0x1] %v12_v1 }
   0x3 LB: > { %s695_s26 = sadd.s32 4294967295, %s755_s25   ;;  %p699_p0 = scmp.ge.s32.totalorder %s755_s25, 1  ;;  %s755_s25 = sphi %s805_s25, %s19_s25  }
   0x4   : > { %p200_p1 = scmp.lt.s32.totalorder %s755_s25, 3 }
   0x6   : > { %p201_p2 = pnand %p699_p0, %p200_p1 }
   0x8   : > { %204 = sbr.rel (%p201_p2) target bundleno = 261 (0x105), region = 40 }
   0xf   : > { %v816_v2 = vld [vmem:[%s927_s0 + $0x10] sm:$0xff]  ;;  %v821_v3 = vld [vmem:[%s927_s0] sm:$0xff]  ;;  %v260_v4 = vlaneseq  ;;  %v757_v5 = vmov 0   ;;  %s825_s29 = sshll.u32 %s695_s26, 1  ;;  %v305_v7 = vld [vmem:[%s927_s0 + $0x8] sm:$0xff]  ;;  %s709_s14 = sshll.u32 %s695_s26, 8 }
  0x10   : > { %727 = vset.pattern.permute.xlu1 %v757_v5  ;;  %726 = vset.pattern.permute.xlu0 %v757_v5  ;;  %p236_p3 = scmp.lt.s32.totalorder %s825_s29, 2  ;;  %s250_s30 = ssub.s32 2, %s825_s29  ;;  %v308_v6 = vld [vmem:[%s928_s1] sm:$0xff]  ;;  %v309_v11 = vld [vmem:[%s928_s1 + $0x8] sm:$0xff]  ;;  %v268_v12 = vstv %s709_s14  ;;  %v758_v17 = vmov 1   ;;  %v310_v25 = vld [vmem:[%s928_s1 + $0x10] sm:$0xff] }
  0x11   : > { %324 = vperm.xlu1 %727, %v816_v2   ;;  %314 = vperm.xlu0 %726, %v821_v3   ;;  %p251_p4 = scmp.lt.s32.totalorder %s250_s30, 0  ;;  %v257_v8 = vstv %s250_s30  ;;  %v838_v9 = vshrl.u32 %v260_v4, 7  ;;  %v267_v10 = vand.u32 127, %v260_v4  ;;  %s275_s21 = sadd.s32 1, %s825_s29  ;;  %v307_v22 = vld [vmem:[%s927_s0 + $0x18] sm:$0x3f] }
  0x12   : > { %s237_s11 = scalar_select %p236_p3, %s825_s29, 2  ;;  %vm258_vm0 = vcmp.lt.s32.totalorder %v257_v8, 0  ;;  %v759_v28 = vmov 2   ;;  %v311_v29 = vld [vmem:[%s928_s1 + $0x18] sm:$0x3f]  ;;  %v760_v30 = vmov 3  }
  0x13   : > { %s252_s12 = scalar_select %p251_p4, 0, 255  ;;  %vm263_vm1 = vcmp.lt.s32.totalorder %v838_v9, 4  ;;  %v269_v14 = vadd.s32 %v268_v12, %v267_v10  ;;  %v546_v31 = vld [vmem:[%s929_s2 + $0x8] sm:$0xff]  ;;  %v598_v32 = vld [vmem:[#allocation7] sm:$0x1] }
  0x14   : > { %s701_s13 = sshll.u32 %s237_s11, 2  ;;  %s711_s22 = sadd.s32 128, %s709_s14  ;;  %v545_v33 = vld [vmem:[%s929_s2] sm:$0xff]  ;;  %v547_v34 = vld [vmem:[%s929_s2 + $0x10] sm:$0xff]  ;;  %v548_v35 = vld [vmem:[%s929_s2 + $0x18] sm:$0x3f] }
  0x15   : > { %361 = vperm.xlu1 %727, %v308_v6   ;;  %319 = vperm.xlu0 %726, %v305_v7   ;;  %s848_s19 = scalar_lea.vmem %s931_s4, %s701_s13  ;;  %s253_s20 = sand.u32 15, %s252_s12  ;;  %v296_v16 = vstv %s711_s22  ;;  %vm270_vm2 = vcmp.lt.s32.totalorder %v269_v14, 300  ;;  %v898_v46 = vsub.s32 0, %v838_v9  ;;  %v339_v47 = vsub.s32 4, %v838_v9 }
  0x16   : > { %v255_v13 = vld [vmem:[%s848_s19] sm:%s253_s20]  ;;  %s276_s23 = ssub.s32 2, %s275_s21  ;;  %v297_v21 = vadd.s32 %v296_v16, %v267_v10  ;;  %v405_v50 = vsub.s32 1, %v838_v9  ;;  %v409_v51 = vsub.s32 5, %v838_v9  ;;  %v455_v54 = vsub.s32 2, %v838_v9  ;;  %p246_p6 = scmp.lt.s32.totalorder %s825_s29, 3 }
  0x17   : > { %v259_v15 = vsel %vm258_vm0, %v800_v0, %v255_v13  ;;  %p277_p5 = scmp.lt.s32.totalorder %s276_s23, 0  ;;  %v284_v19 = vstv %s276_s23  ;;  %v459_v55 = vsub.s32 6, %v838_v9  ;;  %v505_v1 = vsub.s32 3, %v838_v9 }
  0x18   : > { %v264_v18 = vsel %vm263_vm1, %v259_v15, %v800_v0  ;;  %vm285_vm3 = vcmp.lt.s32.totalorder %v284_v19, 0  ;;  %vm298_vm4 = vcmp.lt.s32.totalorder %v297_v21, 300  ;;  %vm579_vm5 = vcmask 1045504   ;;  %s935_s29 = smov (!%p246_p6, %s825_s29), 3 }
  0x19   : > { %728 = vset.pattern.permute.xlu1 %v758_v17  ;;  %366 = vperm.xlu0 %726, %v309_v11   ;;  %v271_v20 = vsel %vm270_vm2, %v264_v18, %v800_v0  ;;  %s278_s24 = scalar_select %p277_p5, 0, 255  ;;  %vm642_vm6 = vcmp.lt.s32.totalorder %v260_v4, 256 }
  0x1a   : > { %388 = vperm.xlu1 %728, %v821_v3   ;;  %273 = vst [vmem:[#allocation8] sm:$0xf] %v271_v20  ;;  %s248_s18 = scalar_lea.vmem %s933_s6, %s935_s29 }
  0x1b   : > { %s279_s27 = sand.u32 15, %s278_s24 }
  0x1c   : > { %v705_v23 = vld [vmem:[%s848_s19 + $0x4] sm:%s279_s27] }
  0x1d   : > { %729 = vset.pattern.permute.xlu0 %v758_v17  ;;  %v286_v24 = vsel %vm285_vm3, %v800_v0, %v705_v23 }
  0x1e   : > { %730 = vset.pattern.permute.xlu1 %v757_v5  ;;  %392 = vperm.xlu0 %729, %v305_v7   ;;  %v291_v26 = vsel %vm263_vm1, %v286_v24, %v800_v0 }
  0x1f   : > { %329 = vperm.xlu1 %730, %v307_v22   ;;  %v299_v27 = vsel %vm298_vm4, %v291_v26, %v800_v0 }
  0x20   : > { %302 = vst [vmem:[#allocation8 + $0x4] sm:$0xf] %v299_v27 }
  0x22   : > { %396 = vperm.xlu0 %729, %v816_v2  }
  0x23   : > { %371 = vperm.xlu1 %730, %v310_v25  }
  0x26   : > { %732 = vset.pattern.permute.xlu0 %v759_v28 }
  0x27   : > { %731 = vset.pattern.permute.xlu1 %v759_v28  ;;  %442 = vperm.xlu0 %732, %v305_v7   ;;  %v303_v48 = vld [vmem:[#allocation8] sm:$0xff] }
  0x28   : > { %438 = vperm.xlu1 %731, %v821_v3   ;;  %v336_v52 = vrot.slane %v303_v48, %v898_v46  ;;  %v340_v53 = vrot.slane %v303_v48, %v339_v47  ;;  %v406_v57 = vrot.slane %v303_v48, %v405_v50  ;;  %v410_v58 = vrot.slane %v303_v48, %v409_v51 }
  0x29   : > { %v456_v62 = vrot.slane %v303_v48, %v455_v54  ;;  %v460_v63 = vrot.slane %v303_v48, %v459_v55  ;;  %v506_v14 = vrot.slane %v303_v48, %v505_v1 }
  0x2a   : > { %v346_v59 = vrot.slane %v336_v52, %v898_v46  ;;  %v350_v60 = vrot.slane %v340_v53, %v898_v46  ;;  %v420_v8 = vrot.slane %v410_v58, %v405_v50 }
  0x2b   : > { %446 = vperm.xlu0 %732, %v816_v2   ;;  %v466_v10 = vrot.slane %v456_v62, %v455_v54  ;;  %v470_v11 = vrot.slane %v460_v63, %v455_v54 }
  0x2c   : > { %733 = vset.pattern.permute.xlu1 %v757_v5 }
  0x2d   : > { %376 = vperm.xlu1 %733, %v311_v29  }
  0x2f   : > { %736 = vset.pattern.permute.xlu0 %v760_v30 }
  0x30   : > { %492 = vperm.xlu0 %736, %v305_v7   ;;  %v416_v7 = vrot.slane %v406_v57, %v405_v50 }
  0x31   : > { %734 = vset.pattern.permute.xlu1 %v758_v17 }
  0x32   : > { %400 = vperm.xlu1 %734, %v307_v22  }
  0x34   : > { %500 = vperm.xlu0 %736, %v307_v22  }
  0x36   : > { %735 = vset.pattern.permute.xlu1 %v760_v30 }
  0x37   : > { %488 = vperm.xlu1 %735, %v821_v3  }
  0x38   : > { %740 = vset.pattern.permute.xlu0 %v757_v5 }
  0x39   : > { %556 = vperm.xlu0 %740, %v546_v31  }
  0x3b   : > { %737 = vset.pattern.permute.xlu1 %v759_v28 }
  0x3c   : > { %450 = vperm.xlu1 %737, %v307_v22  }
  0x3d   : > { %601 = vperm.xlu0 %740, %v598_v32  }
  0x40   : > { %738 = vset.pattern.permute.xlu1 %v760_v30 }
  0x41   : > { %496 = vperm.xlu1 %738, %v816_v2   ;;  %v509_v2 = vsub.s32 7, %v838_v9 }
  0x43   : > { %v510_v15 = vrot.slane %v303_v48, %v509_v2 }
  0x45   : > { %739 = vset.pattern.permute.xlu1 %v757_v5 }
  0x46   : > { %551 = vperm.xlu1 %739, %v545_v33  }
  0x4a   : > { %561 = vperm.xlu1 %739, %v547_v34   ;;  %v516_v34 = vrot.slane %v506_v14, %v505_v1 }
  0x4e   : > { %566 = vperm.xlu1 %739, %v548_v35   ;;  %v520_v35 = vrot.slane %v510_v15, %v505_v1 }
  0x90   : > { %v325_v36 = vpop.permute.xlu1 %324  ;;  %v315_v37 = vpop.permute.xlu0 %314 }
  0x91   : > { %v351_v12 = vmul.f32 %v346_v59, %v315_v37  ;;  %v352_v13 = vmul.f32 %v350_v60, %v315_v37  ;;  %v355_v16 = vmul.f32 %v346_v59, %v325_v36  ;;  %v356_v17 = vmul.f32 %v350_v60, %v325_v36 }
  0x94   : > { %v362_v38 = vpop.permute.xlu1 %361  ;;  %v320_v39 = vpop.permute.xlu0 %319 }
  0x95   : > { %v353_v5 = vmul.f32 %v346_v59, %v320_v39  ;;  %v354_v6 = vmul.f32 %v350_v60, %v320_v39  ;;  %v379_v30 = vadd.f32 %v362_v38, %v351_v12  ;;  %v380_v31 = vadd.f32 %v362_v38, %v352_v13 }
  0x98   : > { %v367_v41 = vpop.permute.xlu0 %366 }
  0x99   : > { %v389_v40 = vpop.permute.xlu1 %388  ;;  %v381_v18 = vadd.f32 %v367_v41, %v353_v5  ;;  %v382_v19 = vadd.f32 %v367_v41, %v354_v6 }
  0x9a   : > { %v421_v22 = vmul.f32 %v416_v7, %v389_v40  ;;  %v422_v23 = vmul.f32 %v420_v8, %v389_v40 }
  0x9c   : > { %v429_v37 = vadd.f32 %v421_v22, %v379_v30  ;;  %v430_v36 = vadd.f32 %v422_v23, %v380_v31 }
  0x9d   : > { %v393_v44 = vpop.permute.xlu0 %392 }
  0x9e   : > { %v330_v42 = vpop.permute.xlu1 %329  ;;  %v423_v24 = vmul.f32 %v416_v7, %v393_v44  ;;  %v424_v25 = vmul.f32 %v420_v8, %v393_v44 }
  0x9f   : > { %v357_v48 = vmul.f32 %v346_v59, %v330_v42  ;;  %v358_v50 = vmul.f32 %v350_v60, %v330_v42 }
  0xa0   : > { %v431_v39 = vadd.f32 %v423_v24, %v381_v18  ;;  %v432_v41 = vadd.f32 %v424_v25, %v382_v19 }
  0xa1   : > { %v397_v49 = vpop.permute.xlu0 %396 }
  0xa2   : > { %v372_v43 = vpop.permute.xlu1 %371  ;;  %v425_v28 = vmul.f32 %v416_v7, %v397_v49  ;;  %v426_v29 = vmul.f32 %v420_v8, %v397_v49 }
  0xa3   : > { %v383_v26 = vadd.f32 %v372_v43, %v355_v16  ;;  %v384_v27 = vadd.f32 %v372_v43, %v356_v17 }
  0xa5   : > { %v433_v40 = vadd.f32 %v425_v28, %v383_v26  ;;  %v434_v51 = vadd.f32 %v426_v29, %v384_v27 }
  0xa6   : > { %v443_v61 = vpop.permute.xlu0 %442 }
  0xa7   : > { %v895_v45 = vpop.permute.xlu1 %438  ;;  %v473_v32 = vmul.f32 %v466_v10, %v443_v61  ;;  %v474_v33 = vmul.f32 %v470_v11, %v443_v61 }
  0xa8   : > { %v471_v49 = vmul.f32 %v466_v10, %v895_v45  ;;  %v472_v38 = vmul.f32 %v470_v11, %v895_v45 }
  0xa9   : > { %v481_v52 = vadd.f32 %v473_v32, %v431_v39  ;;  %v482_v43 = vadd.f32 %v474_v33, %v432_v41 }
  0xaa   : > { %v447_v20 = vpop.permute.xlu0 %446  ;;  %v479_v5 = vadd.f32 %v471_v49, %v429_v37  ;;  %v480_v6 = vadd.f32 %v472_v38, %v430_v36 }
  0xab   : > { %v475_v53 = vmul.f32 %v466_v10, %v447_v20  ;;  %v476_v54 = vmul.f32 %v470_v11, %v447_v20 }
  0xac   : > { %v906_v56 = vpop.permute.xlu1 %376 }
  0xad   : > { %v385_v59 = vadd.f32 %v906_v56, %v357_v48  ;;  %v386_v42 = vadd.f32 %v906_v56, %v358_v50  ;;  %v483_v45 = vadd.f32 %v475_v53, %v433_v40  ;;  %v484_v14 = vadd.f32 %v476_v54, %v434_v51 }
  0xaf   : > { %v493_v44 = vpop.permute.xlu0 %492 }
  0xb0   : > { %v523_v58 = vmul.f32 %v516_v34, %v493_v44  ;;  %v524_v61 = vmul.f32 %v520_v35, %v493_v44 }
  0xb1   : > { %v401_v3 = vpop.permute.xlu1 %400 }
  0xb2   : > { %v427_v55 = vmul.f32 %v416_v7, %v401_v3  ;;  %v428_v57 = vmul.f32 %v420_v8, %v401_v3  ;;  %v531_v8 = vadd.f32 %v523_v58, %v481_v52  ;;  %v532_v16 = vadd.f32 %v524_v61, %v482_v43 }
  0xb3   : > { %v501_v3 = vpop.permute.xlu0 %500 }
  0xb4   : > { %v435_v15 = vadd.f32 %v427_v55, %v385_v59  ;;  %v436_v7 = vadd.f32 %v428_v57, %v386_v42  ;;  %v527_v19 = vmul.f32 %v516_v34, %v501_v3  ;;  %v528_v20 = vmul.f32 %v520_v35, %v501_v3 }
  0xb5   : > { %v539_v26 = vmax.f32 %v531_v8, 0.0  ;;  %v540_v27 = vmax.f32 %v532_v16, 0.0 }
  0xb6   : > { %v489_v21 = vpop.permute.xlu1 %488 }
  0xb7   : > { %v521_v62 = vmul.f32 %v516_v34, %v489_v21  ;;  %v522_v63 = vmul.f32 %v520_v35, %v489_v21 }
  0xb8   : > { %v557_v25 = vpop.permute.xlu0 %556 }
  0xb9   : > { %v529_v17 = vadd.f32 %v521_v62, %v479_v5  ;;  %v530_v18 = vadd.f32 %v522_v63, %v480_v6  ;;  %v571_v36 = vmul.f32 %v557_v25, %v539_v26 }
  0xbb   : > { %v451_v47 = vpop.permute.xlu1 %450  ;;  %v537_v23 = vmax.f32 %v529_v17, 0.0  ;;  %v538_v24 = vmax.f32 %v530_v18, 0.0 }
  0xbc   : > { %v477_v60 = vmul.f32 %v466_v10, %v451_v47  ;;  %v478_v1 = vmul.f32 %v470_v11, %v451_v47 }
  0xbe   : > { %v485_v21 = vadd.f32 %v477_v60, %v435_v15  ;;  %v486_v56 = vadd.f32 %v478_v1, %v436_v7  ;;  %v602_v60 = vpop.permute.xlu0 %601 }
  0xbf   : > { %v607_v5 = vrot.slane %v602_v60, %v898_v46 }
  0xc0   : > { %v497_v2 = vpop.permute.xlu1 %496  ;;  %v535_v28 = vadd.f32 %v527_v19, %v485_v21  ;;  %v536_v29 = vadd.f32 %v528_v20, %v486_v56  ;;  %v761_v19 = vmov 1966171168  }
  0xc1   : > { %v525_v12 = vmul.f32 %v516_v34, %v497_v2  ;;  %v526_v13 = vmul.f32 %v520_v35, %v497_v2  ;;  %v572_v34 = vmul.f32 %v557_v25, %v540_v27  ;;  %v626_v46 = vunpack.c.l.s4 %v761_v19 }
  0xc2   : > { %v543_v41 = vmax.f32 %v535_v28, 0.0  ;;  %v544_v47 = vmax.f32 %v536_v29, 0.0 }
  0xc3   : > { %v533_v10 = vadd.f32 %v525_v12, %v483_v45  ;;  %v534_v11 = vadd.f32 %v526_v13, %v484_v14  ;;  %v627_v20 = vunpack.c.0.s8 %v626_v46 }
  0xc5   : > { %v552_v22 = vpop.permute.xlu1 %551  ;;  %v541_v33 = vmax.f32 %v533_v10, 0.0  ;;  %v542_v37 = vmax.f32 %v534_v11, 0.0  ;;  %v630_v56 = vsub.s32 %v627_v20, %v838_v9 }
  0xc6   : > { %v569_v30 = vmul.f32 %v552_v22, %v537_v23  ;;  %v570_v31 = vmul.f32 %v552_v22, %v538_v24 }
  0xc8   : > { %v577_v48 = vadd.f32 %v571_v36, %v569_v30  ;;  %v588_v50 = vadd.f32 %v572_v34, %v570_v31 }
  0xc9   : > { %v562_v32 = vpop.permute.xlu1 %561 }
  0xca   : > { %v573_v35 = vmul.f32 %v562_v32, %v541_v33  ;;  %v574_v39 = vmul.f32 %v562_v32, %v542_v37 }
  0xcc   : > { %v578_v52 = vadd.f32 %v577_v48, %v573_v35  ;;  %v589_v43 = vadd.f32 %v588_v50, %v574_v39 }
  0xcd   : > { %v567_v40 = vpop.permute.xlu1 %566 }
  0xce   : > { %v575_v51 = vmul.f32 %v567_v40, %v543_v41  ;;  %v576_v44 = vmul.f32 %v567_v40, %v544_v47 }
  0xd0   : > { %v580_v49 = vsel %vm579_vm5, %v575_v51, 0.0  ;;  %v590_v38 = vsel %vm579_vm5, %v576_v44, 0.0 }
  0xd1   : > { %v581_v53 = vadd.f32 %v580_v49, %v578_v52  ;;  %v591_v54 = vadd.f32 %v590_v38, %v589_v43 }
  0xd3   : > { %v582_v55 = vrot.slane %v581_v53, 4  ;;  %v592_v57 = vrot.slane %v591_v54, 4 }
  0xd5   : > { %v583_v58 = vadd.f32 %v582_v55, %v581_v53  ;;  %v593_v61 = vadd.f32 %v592_v57, %v591_v54 }
  0xd7   : > { %v584_v62 = vrot.slane %v583_v58, 2  ;;  %v594_v63 = vrot.slane %v593_v61, 2 }
  0xd9   : > { %v585_v59 = vadd.f32 %v584_v62, %v583_v58  ;;  %v595_v42 = vadd.f32 %v594_v63, %v593_v61 }
  0xdb   : > { %v586_v1 = vrot.slane %v585_v59, 1  ;;  %v596_v2 = vrot.slane %v595_v42, 1 }
  0xdd   : > { %v587_v6 = vadd.f32 %v586_v1, %v585_v59  ;;  %v597_v12 = vadd.f32 %v596_v2, %v595_v42 }
  0xdf   : > { %v608_v13 = vadd.f32 %v607_v5, %v587_v6  ;;  %v609_v45 = vadd.f32 %v607_v5, %v597_v12 }
  0xe1   : > { %v610_v14 = vsub.f32 0.0, %v608_v13  ;;  %v611_v15 = vsub.f32 0.0, %v609_v45 }
  0xe3   : > { %v612_v7 = vmul.f32 1.442695, %v610_v14  ;;  %v614_v3 = vmul.f32 1.442695, %v611_v15 }
  0xe5   : > { %741 = vpow2.f32 %v612_v7 }
  0xe6   : > { %743 = vpow2.f32 %v614_v3 }
  0xef   : > { %v742_v8 = vpop.eup %741 }
  0xf0   : > { %v744_v16 = vpop.eup %743  ;;  %v616_v17 = vadd.f32 1.0, %v742_v8 }
  0xf1   : > { %v617_v18 = vadd.f32 1.0, %v744_v16 }
  0xf2   : > { %745 = vrcp.f32 %v616_v17 }
  0xf3   : > { %747 = vrcp.f32 %v617_v18 }
  0xfc   : > { %v746_v21 = vpop.eup %745 }
  0xfd   : > { %v748_v10 = vpop.eup %747 }
  0xfe   : > { %v624_v11 = vcombine.low %v746_v21, %v748_v10 }
 0x100   : > { %v631_v22 = vrot.slane %v624_v11, %v630_v56 }
 0x102   : > { %v638_v23 = vrot.slane %v631_v22, %v630_v56 }
 0x104   : > { %644 = vst.msk [vmem:[%s248_s18] sm:$0x3] %vm642_vm6, %v638_v23 }
 0x105 PF: > { %s19_s25 = sadd.s32 1, %s755_s25  }
 0x106   : > { %p16_p7 = scmp.ge.s32.totalorder %s19_s25, 4  }
 0x108   :  { %18 = sbr.rel (!%p16_p7) target bundleno = 3 (0x3), region = 72 }

</bundles_post_ra>
